<compile_context>
chip_gen: v7x
topology: tpu7x:2x2x1
jax: 0.10.0
libtpu: 0.0.40
codegen_flags: <defaults>
</compile_context>

<pallas_src>
import math
import functools

import jax
import jax.numpy as jnp
from jax import lax
from jax.experimental import pallas as pl
from jax.experimental.pallas import tpu as pltpu


def _pick_tile(total, target):
    # Use the target tile when it divides the extent; otherwise fall back to the full extent.
    # TODO(synk): support ragged tails with in-kernel masking instead of full-extent fallback.
    return target if (total > target and total % target == 0) else total


# ----------------------------- tiled linear kernel -----------------------------

def _linear_kernel(x_ref, w_ref, b_ref, o_ref, *, compute_dtype):
    x = x_ref[...].astype(compute_dtype)                 # (TM, K)
    w = w_ref[...].astype(compute_dtype)                 # (O, K)  VMEM-resident across M tiles
    # y = x @ W^T + b, expressed as a contraction on K of both operands (no XLU transpose).
    acc = lax.dot_general(
        x, w,
        dimension_numbers=(((1,), (1,)), ((), ())),
        preferred_element_type=jnp.float32,
    )                                                    # (TM, O) f32
    o_ref[...] = (acc + b_ref[...]).astype(o_ref.dtype)


def pallas_linear(x2d, w, b, *, tile_m=512, compute_dtype=jnp.bfloat16, out_dtype=None):
    """y = x @ W^T + b.  x2d: (M, K); w: (O, K) [torch nn.Linear layout]; b: (O,)."""
    M, K = x2d.shape
    O = w.shape[0]
    if out_dtype is None:
        out_dtype = compute_dtype
    tm = _pick_tile(M, tile_m)
    # Cast the weight once wrapper-side so the resident VMEM copy (and its DMA) is half-width.
    w_c = w.astype(compute_dtype)
    kernel = functools.partial(_linear_kernel, compute_dtype=compute_dtype)
    # TODO(synk): for F >= 2048, add an output-N grid axis (weight block (TILE_N, K)) and
    # single-buffer the resident weight to respect the v7x 64 MiB VMEM budget.
    return pl.pallas_call(
        kernel,
        out_shape=jax.ShapeDtypeStruct((M, O), out_dtype),
        grid=(M // tm,),
        in_specs=[
            pl.BlockSpec((tm, K), lambda i: (i, 0)),
            pl.BlockSpec((O, K), lambda i: (0, 0)),      # weight stays resident
            pl.BlockSpec((1, O), lambda i: (0, 0)),
        ],
        out_specs=pl.BlockSpec((tm, O), lambda i: (i, 0)),
        compiler_params=pltpu.CompilerParams(
            dimension_semantics=("parallel",),
        ),
    )(x2d, w_c, b.reshape(1, O).astype(jnp.float32))


# ----------------------------- rel-pos attention kernel -----------------------------

def _rel_attn_kernel(qcat_ref, kp_ref, v_ref, nmask_ref, o_ref,
                     m_sc, l_sc, acc_sc, *, n_head, d_k, compute_dtype):
    kc = pl.program_id(2)
    approx = compute_dtype != jnp.float32      # exact divide on the f32 validation path

    @pl.when(kc == 0)
    def _():
        m_sc[...] = jnp.full(m_sc.shape, -jnp.inf, m_sc.dtype)
        l_sc[...] = jnp.zeros(l_sc.shape, l_sc.dtype)
        acc_sc[...] = jnp.zeros(acc_sc.shape, acc_sc.dtype)

    neg = nmask_ref[...]                       # (1, TKV): 0.0 keep / -10000.0 masked
    masked = neg < 0.0

    alphas = []
    pvs = []
    for h in range(n_head):                    # static unroll over heads
        sl2 = slice(h * 2 * d_k, (h + 1) * 2 * d_k)   # interleaved [qu|qv] / [k|p] stripe
        slv = slice(h * d_k, (h + 1) * d_k)

        q_h = qcat_ref[:, sl2]                 # (TQ, 2dk)  pos-bias + 1/sqrt(dk) pre-folded
        kp_h = kp_ref[:, sl2]                  # (TKV, 2dk) interleaved [k_h | p_h]
        # Single 2*d_k-deep contraction: [qu|qv] . [k|p]^T  ==  ac + bd (already scaled).
        s = lax.dot_general(
            q_h, kp_h,
            dimension_numbers=(((1,), (1,)), ((), ())),
            preferred_element_type=jnp.float32,
        )                                      # (TQ, TKV) f32
        s = s + neg                            # additive mask bias

        # online softmax (f32 on all generations; v5e has no bf16 VPU/EUP)
        m_prev = m_sc[h]                                             # (TQ, 1)
        m_new = jnp.maximum(m_prev, jnp.max(s, axis=-1, keepdims=True))
        alpha = jnp.exp(m_prev - m_new)                              # (TQ, 1)
        p = jnp.exp(s - m_new)                                       # (TQ, TKV)
        l_sc[h] = alpha * l_sc[h] + jnp.sum(p, axis=-1, keepdims=True)
        m_sc[h] = m_new

        p_z = jnp.where(masked, 0.0, p)        # torch parity: post-softmax zeroing of masked keys
        pv = jnp.dot(p_z.astype(compute_dtype), v_ref[:, slv].astype(compute_dtype),
                     preferred_element_type=jnp.float32)             # (TQ, dk)
        alphas.append(jnp.broadcast_to(alpha, (alpha.shape[0], d_k)))
        pvs.append(pv)

    # one lane-dense read-modify-write of the (TQ, F) accumulator
    acc_sc[...] = (jnp.concatenate(alphas, axis=-1) * acc_sc[...]
                   + jnp.concatenate(pvs, axis=-1))

    @pl.when(kc == pl.num_programs(2) - 1)
    def _():
        invs = [jnp.broadcast_to(pl.reciprocal(l_sc[h], approx=approx),
                                 (acc_sc.shape[0], d_k))
                for h in range(n_head)]
        # single lane-dense (TQ, F) output store
        o_ref[...] = (acc_sc[...] * jnp.concatenate(invs, axis=-1)).astype(o_ref.dtype)


def rel_attention(qcat, kp, v, neg_mask, *, n_head, d_k, tile_q=256, kv_chunk=512,
                  compute_dtype=jnp.bfloat16, out_dtype=None):
    """qcat: (B,T1,2F) interleaved [qu|qv]; kp: (B,T2,2F) interleaved [k|p]; v: (B,T2,F);
    neg_mask: (B,1,T2) additive 0/-10000 bias.  Returns (B,T1,F)."""
    B, T1, _ = qcat.shape
    F = n_head * d_k
    T2 = kp.shape[1]
    if out_dtype is None:
        out_dtype = compute_dtype
    tq = _pick_tile(T1, tile_q)
    tkv = _pick_tile(T2, kv_chunk)
    kernel = functools.partial(_rel_attn_kernel, n_head=n_head, d_k=d_k,
                               compute_dtype=compute_dtype)
    # TODO(synk): optionally single-buffer the kv-chunk operands (pl.Buffered(1)) on
    # VMEM-tight generations (v5e / v7x) once chunk sizes grow; defaults are fine here.
    return pl.pallas_call(
        kernel,
        out_shape=jax.ShapeDtypeStruct((B, T1, F), out_dtype),
        grid=(B, T1 // tq, T2 // tkv),
        in_specs=[
            pl.BlockSpec((None, tq, 2 * F), lambda b, i, kc: (b, i, 0)),    # qcat (kv-resident)
            pl.BlockSpec((None, tkv, 2 * F), lambda b, i, kc: (b, kc, 0)),  # interleaved [k|p] chunk
            pl.BlockSpec((None, tkv, F), lambda b, i, kc: (b, kc, 0)),      # v chunk
            pl.BlockSpec((None, 1, tkv), lambda b, i, kc: (b, 0, kc)),      # additive mask chunk
        ],
        out_specs=pl.BlockSpec((None, tq, F), lambda b, i, kc: (b, i, 0)),  # lane-dense (TQ, F)
        scratch_shapes=[
            pltpu.VMEM((n_head, tq, 1), jnp.float32),   # m (running max)
            pltpu.VMEM((n_head, tq, 1), jnp.float32),   # l (running denom)
            pltpu.VMEM((tq, F), jnp.float32),           # acc
        ],
        compiler_params=pltpu.CompilerParams(
            dimension_semantics=("parallel", "parallel", "arbitrary"),
        ),
    )(qcat, kp, v, neg_mask)


# ----------------------------- module wrapper -----------------------------

def rel_pos_mha_forward(params, query, key, value, pos_emb, mask, *,
                        compute_dtype=jnp.bfloat16):
    """Pallas implementation of RelPositionMultiHeadedAttention.forward (eval mode)."""
    B, T1, F = query.shape
    T2 = key.shape[1]
    H, dk = params["pos_bias_u"].shape
    f32 = jnp.float32

    # ---- projections (bf16 operands + bf16 outputs by default, f32 accumulation) ----
    if (query is key) and (key is value):
        # self-attention: fuse Q/K/V into one matmul so the activation is read from HBM once
        w_qkv = jnp.concatenate([params["wq"], params["wk"], params["wv"]], axis=0)
        b_qkv = jnp.concatenate([params["bq"], params["bk"], params["bv"]], axis=0)
        qkv = pallas_linear(query.reshape(B * T1, F), w_qkv, b_qkv,
                            compute_dtype=compute_dtype).reshape(B, T1, 3 * F)
        q, k, v = qkv[..., :F], qkv[..., F:2 * F], qkv[..., 2 * F:]
    else:
        q = pallas_linear(query.reshape(B * T1, F), params["wq"], params["bq"],
                          compute_dtype=compute_dtype).reshape(B, T1, F)
        k = pallas_linear(key.reshape(B * T2, F), params["wk"], params["bk"],
                          compute_dtype=compute_dtype).reshape(B, T2, F)
        v = pallas_linear(value.reshape(B * T2, F), params["wv"], params["bv"],
                          compute_dtype=compute_dtype).reshape(B, T2, F)

    zero_bias = jnp.zeros((F,), f32)
    p = pallas_linear(pos_emb.reshape(-1, F), params["wpos"], zero_bias,  # linear_pos: no bias
                      compute_dtype=compute_dtype).reshape(pos_emb.shape[0], -1, F)

    # ---- layout plumbing (pos-bias add + 1/sqrt(dk) scale folded here; per-head interleave
    #      so each head's score matmul is a single lane-aligned 2*dk-deep contraction) ----
    inv_sqrt = 1.0 / math.sqrt(dk)
    q4 = q.reshape(B, T1, H, dk).astype(f32)
    qu = (q4 + params["pos_bias_u"]) * inv_sqrt
    qv = (q4 + params["pos_bias_v"]) * inv_sqrt
    qcat = jnp.stack([qu, qv], axis=-2).reshape(B, T1, 2 * F).astype(compute_dtype)

    k4 = k.reshape(B, T2, H, dk)
    p4 = jnp.broadcast_to(p.reshape(p.shape[0], T2, H, dk), (B, T2, H, dk))
    kp = jnp.stack([k4, p4], axis=-2).reshape(B, T2, 2 * F).astype(compute_dtype)

    # additive mask bias (0 keep / -10000 masked), shape (B, 1, T2)
    neg_mask = jnp.where(mask == 0.0, -10000.0, 0.0).astype(f32)

    x = rel_attention(qcat, kp, v.astype(compute_dtype), neg_mask,
                      n_head=H, d_k=dk, compute_dtype=compute_dtype)      # (B, T1, F)

    out = pallas_linear(x.reshape(B * T1, F), params["wout"], params["bout"],
                        compute_dtype=compute_dtype, out_dtype=f32).reshape(B, T1, F)
    return out


# ----------------------------- pure-JAX reference -----------------------------

def reference_forward(params, query, key, value, pos_emb, mask):
    B, T1, F = query.shape
    T2 = key.shape[1]
    H, dk = params["pos_bias_u"].shape

    def lin(x, w, b):
        return x @ w.T + b

    q = lin(query, params["wq"], params["bq"]).reshape(B, T1, H, dk)
    k = lin(key, params["wk"], params["bk"]).reshape(B, T2, H, dk).transpose(0, 2, 1, 3)
    v = lin(value, params["wv"], params["bv"]).reshape(B, T2, H, dk).transpose(0, 2, 1, 3)
    p = (pos_emb @ params["wpos"].T).reshape(pos_emb.shape[0], -1, H, dk).transpose(0, 2, 1, 3)

    q_u = (q + params["pos_bias_u"]).transpose(0, 2, 1, 3)
    q_v = (q + params["pos_bias_v"]).transpose(0, 2, 1, 3)

    ac = jnp.einsum("bhqd,bhkd->bhqk", q_u, k)
    bd = jnp.einsum("bhqd,xhkd->bhqk", q_v, p)
    scores = (ac + bd) / math.sqrt(dk)

    bad = (mask[:, None, :, :] == 0.0)                 # (B,1,1,T2)
    scores = jnp.where(bad, -10000.0, scores)
    attn = jax.nn.softmax(scores, axis=-1)
    attn = jnp.where(bad, 0.0, attn)

    x = jnp.einsum("bhqk,bhkd->bhqd", attn, v)
    x = x.transpose(0, 2, 1, 3).reshape(B, T1, H * dk)
    return lin(x, params["wout"], params["bout"])


# ----------------------------- setup & run -----------------------------

def init_params(key, n_head, n_feat):
    d_k = n_feat // n_head
    ks = jax.random.split(key, 11)
    limit = math.sqrt(6.0 / (n_head + d_k))  # xavier_uniform for pos biases
    return {
        "wq": jax.random.normal(ks[0], (n_feat, n_feat), jnp.float32) * 0.1,
        "bq": jax.random.normal(ks[1], (n_feat,), jnp.float32) * 0.1,
        "wk": jax.random.normal(ks[2], (n_feat, n_feat), jnp.float32) * 0.1,
        "bk": jax.random.normal(ks[3], (n_feat,), jnp.float32) * 0.1,
        "wv": jax.random.normal(ks[4], (n_feat, n_feat), jnp.float32) * 0.1,
        "bv": jax.random.normal(ks[5], (n_feat,), jnp.float32) * 0.1,
        "wpos": jax.random.normal(ks[6], (n_feat, n_feat), jnp.float32) * 0.1,  # no bias
        "wout": jax.random.normal(ks[7], (n_feat, n_feat), jnp.float32) * 0.1,
        "bout": jax.random.normal(ks[8], (n_feat,), jnp.float32) * 0.1,
        "pos_bias_u": jax.random.uniform(ks[9], (n_head, d_k), jnp.float32, -limit, limit),
        "pos_bias_v": jax.random.uniform(ks[10], (n_head, d_k), jnp.float32, -limit, limit),
    }


if __name__ == "__main__":
    B, T, n_feat, n_head = 2, 8, 32, 4

    root = jax.random.PRNGKey(0)
    kparam, kq, kk, kv, kpos = jax.random.split(root, 5)
    params = init_params(kparam, n_head, n_feat)

    query = jax.random.normal(kq, (B, T, n_feat), jnp.float32)
    key = jax.random.normal(kk, (B, T, n_feat), jnp.float32)
    value = jax.random.normal(kv, (B, T, n_feat), jnp.float32)
    pos_emb = jax.random.normal(kpos, (1, T, n_feat), jnp.float32)

    # (B, 1, T2) padding mask: batch 1 has the last 2 key frames masked out.
    mask = jnp.ones((B, 1, T), jnp.float32).at[1, 0, T - 2:].set(0.0)

    # 1) cross-attention, f32 compute path: bit-faithful validation vs pure-JAX reference.
    out_f32 = rel_pos_mha_forward(params, query, key, value, pos_emb, mask,
                                  compute_dtype=jnp.float32)
    out_f32 = jax.block_until_ready(out_f32)
    ref = reference_forward(params, query, key, value, pos_emb, mask)
    assert out_f32.shape == (B, T, n_feat)
    assert jnp.allclose(out_f32, ref, atol=1e-4, rtol=1e-4), \
        float(jnp.max(jnp.abs(out_f32 - ref)))

    # 2) self-attention, default bf16 path (fused QKV projection, bf16 MXU operands).
    out_bf16 = rel_pos_mha_forward(params, query, query, query, pos_emb, mask)
    out_bf16 = jax.block_until_ready(out_bf16)
    ref_self = reference_forward(params, query, query, query, pos_emb, mask)
    assert out_bf16.shape == (B, T, n_feat)
    assert jnp.allclose(out_bf16, ref_self, atol=5e-2, rtol=5e-2), \
        float(jnp.max(jnp.abs(out_bf16 - ref_self)))

    print("KERNEL_OK")
</pallas_src>

<mosaic_0001>
module attributes {stable_mosaic.version = 11 : i64} {
  func.func @_linear_kernel(%arg0: i32, %arg1: memref<16x32xf32, #tpu.memory_space<vmem>>, %arg2: memref<32x32xf32, #tpu.memory_space<vmem>>, %arg3: memref<1x32xf32, #tpu.memory_space<vmem>>, %arg4: memref<16x32xf32, #tpu.memory_space<vmem>>) attributes {dimension_semantics = [#tpu.dimension_semantics<parallel>], iteration_bounds = array<i64: 1>, scalar_prefetch = 0 : i64, scratch_operands = 0 : i64, tpu.core_type = #tpu.core_type<tc>, window_params = [{transform_indices = @transform_0, window_bounds = array<i64: 16, 32>}, {pipeline_mode = #tpu.pipeline_mode<synchronous>, transform_indices = @transform_1, window_bounds = array<i64: 32, 32>}, {pipeline_mode = #tpu.pipeline_mode<synchronous>, transform_indices = @transform_2, window_bounds = array<i64: 1, 32>}, {transform_indices = @transform_3, window_bounds = array<i64: 16, 32>}]} {
    %c0 = arith.constant 0 : index
    %c0_0 = arith.constant 0 : index
    %0 = vector.load %arg1[%c0, %c0_0] : memref<16x32xf32, #tpu.memory_space<vmem>>, vector<16x32xf32>
    %c0_1 = arith.constant 0 : index
    %c0_2 = arith.constant 0 : index
    %1 = vector.load %arg2[%c0_1, %c0_2] : memref<32x32xf32, #tpu.memory_space<vmem>>, vector<32x32xf32>
    %cst = arith.constant dense<0.000000e+00> : vector<16x32xf32>
    %2 = tpu.matmul %0, %1, %cst {dimension_numbers = #tpu.dot_dimension_numbers<[1], [1], [0], [0], [0, 0, 1, 0], [], []>} : vector<16x32xf32>, vector<32x32xf32>, vector<16x32xf32> -> vector<16x32xf32>
    %c0_3 = arith.constant 0 : index
    %c0_4 = arith.constant 0 : index
    %3 = vector.load %arg3[%c0_3, %c0_4] : memref<1x32xf32, #tpu.memory_space<vmem>>, vector<1x32xf32>
    %4 = vector.broadcast %3 : vector<1x32xf32> to vector<16x32xf32>
    %5 = arith.addf %2, %4 : vector<16x32xf32>
    %c0_5 = arith.constant 0 : index
    %c0_6 = arith.constant 0 : index
    %6 = vector.load %arg4[%c0_5, %c0_6] : memref<16x32xf32, #tpu.memory_space<vmem>>, vector<16x32xf32>
    tpu.vector_store %arg4[%c0_5, %c0_6], %5 {strides = array<i32>} : memref<16x32xf32, #tpu.memory_space<vmem>>, vector<16x32xf32>,
    return
  }
  func.func @transform_0(%arg0: i32) -> (i32, i32) {
    %c0_i32 = arith.constant 0 : i32
    %c0_i32_0 = arith.constant 0 : i32
    return %arg0, %c0_i32 : i32, i32
  }
  func.func @transform_1(%arg0: i32) -> (i32, i32) {
    %c0_i32 = arith.constant 0 : i32
    %c0_i32_0 = arith.constant 0 : i32
    %c0_i32_1 = arith.constant 0 : i32
    return %c0_i32, %c0_i32_0 : i32, i32
  }
  func.func @transform_2(%arg0: i32) -> (i32, i32) {
    %c0_i32 = arith.constant 0 : i32
    %c0_i32_0 = arith.constant 0 : i32
    %c0_i32_1 = arith.constant 0 : i32
    return %c0_i32, %c0_i32_0 : i32, i32
  }
  func.func @transform_3(%arg0: i32) -> (i32, i32) {
    %c0_i32 = arith.constant 0 : i32
    %c0_i32_0 = arith.constant 0 : i32
    return %arg0, %c0_i32 : i32, i32
  }
}

</mosaic_0001>

<bundles_post_ra>
// kernel: tpu_custom_call.1
= control target key start
LH: loop header
LB: loop body
LE: loop exit
PB: predicated region body
PF: predicated region fallthrough
CT: control target
= control target key end

     0   :  { %8 = vsyncpa [#allocation3], 0  ;;  %s362_s0 = inlined_call_operand.hbm [shape: f32[16,32], index: 0, kind: input, shape index: {}]   ;;  %s363_s1 = inlined_call_operand.hbm [shape: f32[32,32], index: 1, kind: input, shape index: {}]   ;;  %s364_s2 = inlined_call_operand.vmem [shape: f32[1,32], index: 2, kind: input, shape index: {}]   ;;  %s365_s3 = inlined_call_operand.hbm [shape: f32[16,32], index: 3, kind: output, shape index: {}]  }
   0x1   :  { %9 = vsyncpa [#allocation6], 0 }
   0x2   :  { %10 = vsyncpa [#allocation4], 0  ;;  %s283_s12 = smov [#allocation2]   ;;  %s211_s16 = scalar_lea.hbm %s362_s0, 256 }
   0x3   :  { %s16_s13 = sshll.u32 %s283_s12, 4  ;;  %p212_p0 = scmp.ne.s32.totalorder %s362_s0, %s211_s16  ;;  %s17_s13 = int_to_ptr.vmem [resolvable:$true] %s16_s13 }
   0x4   :  { %p215_p1 = scmp.lt.u32.totalorder %s211_s16, %s362_s0 }
   0x6   :  { %p217_p2 = pnand %p215_p1, %p212_p0 }
   0x8   :  { %220 = shalt.err (!%p217_p2)
}
   0x9   :  { %s221_s21 = scalar_lea.vmem %s17_s13, 256  ;;  %p226_p4 = scmp.lt.s32.totalorder %s17_s13, %s17_s13 }
   0xa   :  { %p222_p3 = scmp.ne.s32.totalorder %s17_s13, %s221_s21  ;;  %p227_p5 = scmp.lt.s32.totalorder %s221_s21, %s221_s21 }
   0xc   :  { %p228_p6 = por %p227_p5, %p226_p4 }
   0xe   :  { %p229_p7 = pnand %p228_p6, %p222_p3 }
  0x10   :  { %232 = shalt.err (!%p229_p7)
}
  0x11   :  { %s284_s22 = smov 128   ;;  %s285_s23 = smov 8  }
  0x12   :  { %22 = dma.hbm_to_vmem [thread:$0]  %s362_s0, 256, %s17_s13, [#allocation3], %s284_s22, %s284_s22, %s285_s23  }
  0x13   :  { %s286_s26 = smov [#allocation5]   ;;  %s233_s30 = scalar_lea.hbm %s363_s1, 512 }
  0x14   :  { %s28_s27 = sshll.u32 %s286_s26, 4  ;;  %p234_p8 = scmp.ne.s32.totalorder %s363_s1, %s233_s30  ;;  %s29_s27 = int_to_ptr.vmem [resolvable:$true] %s28_s27 }
  0x15   :  { %p237_p9 = scmp.lt.u32.totalorder %s233_s30, %s363_s1 }
  0x17   :  { %p239_p10 = pnand %p237_p9, %p234_p8 }
  0x19   :  { %242 = shalt.err (!%p239_p10)
}
  0x1a   :  { %s243_s8 = scalar_lea.vmem %s29_s27, 512  ;;  %p248_p12 = scmp.lt.s32.totalorder %s29_s27, %s29_s27 }
  0x1b   :  { %p244_p11 = scmp.ne.s32.totalorder %s29_s27, %s243_s8  ;;  %p249_p13 = scmp.lt.s32.totalorder %s243_s8, %s243_s8 }
  0x1d   :  { %p250_p0 = por %p249_p13, %p248_p12 }
  0x1f   :  { %p251_p1 = pnand %p250_p0, %p244_p11 }
  0x21   :  { %254 = shalt.err (!%p251_p1)
}
  0x22   :  { %34 = dma.hbm_to_vmem [thread:$0]  %s363_s1, 512, %s29_s27, [#allocation6], %s284_s22, %s284_s22, %s285_s23  }
  0x23   :  { %277 = dma.done.wait [#allocation3], 256  }
  0x24   :  { %278 = vsyncadd [#allocation3], 4294967040 }
  0x25   :  { %279 = dma.done.wait [#allocation6], 512  }
  0x26   :  { %280 = vsyncadd [#allocation6], 4294966784  ;;  %vm56_vm0 = vcmask 261120   ;;  %v45_v0 = vld [vmem:[#allocation5] sm:$0xff]  ;;  %v46_v1 = vld [vmem:[#allocation5 + $0x8] sm:$0xff]  ;;  %s287_s11 = smov [#allocation7]  }
  0x27   :  { %vm195_vm1 = vmpackc.low %vm56_vm0, %vm56_vm0  ;;  %v47_v2 = vld [vmem:[#allocation5 + $0x10] sm:$0xff]  ;;  %v194_v3 = vpack.c.bf16 %v46_v1, %v45_v0  ;;  %v48_v4 = vld [vmem:[#allocation5 + $0x18] sm:$0xff]  ;;  %s157_s12 = sshll.u32 %s287_s11, 4  ;;  %s158_s12 = int_to_ptr.vmem [resolvable:$true] %s157_s12 }
  0x28   :  { %v43_v5 = vld [vmem:[#allocation2] sm:$0xff]  ;;  %v200_v6 = vpack.c.bf16 %v48_v4, %v47_v2  ;;  %v44_v7 = vld [vmem:[#allocation2 + $0x8] sm:$0xff]  ;;  %s255_s13 = scalar_lea.vmem %s158_s12, 256  ;;  %p260_p3 = scmp.lt.s32.totalorder %s158_s12, %s158_s12 }
  0x29   :  { %191 = vmatprep.mubr.msk.f32.mxu0 %vm56_vm0, %v43_v5  ;;  %196 = vmatprep.subr.msk.bf16.mxu0 %vm195_vm1, %v194_v3  ;;  %v170_v8 = vld [vmem:[%s364_s2] ss:$0 sm:$0xff]  ;;  %p256_p2 = scmp.ne.s32.totalorder %s158_s12, %s255_s13  ;;  %p261_p4 = scmp.lt.s32.totalorder %s255_s13, %s255_s13 }
  0x2a   :  { %199 = vmatpush3.bf16.xpose.msk.msra.mxu0 %vm195_vm1, %v194_v3 }
  0x2b   :  { %202 = vmatprep.subr.msk.bf16.mxu0 %vm195_vm1, %v200_v6  ;;  %p262_p5 = por %p261_p4, %p260_p3 }
  0x2d   :  { %p263_p6 = pnand %p262_p5, %p256_p2 }
  0x32   :  { %205 = vmatpush3.bf16.xpose.msk.msra.mxu0 %vm195_vm1, %v200_v6 }
  0x39   :  { %192 = vmatmul.mubr.msk.f32.vlgmr.msra.gmra.mrb[0].mxu0 %vm56_vm0, %v44_v7 }
 0x10c   :  { %v193_v9 = vpop.f32.mrb[0].mxu0 }
 0x10d   :  { %v147_v10 = vadd.f32 %v193_v9, %v170_v8  ;;  %v141_v11 = vpop.f32.mrb[1].mxu0 }
 0x10e   :  { %v142_v12 = vadd.f32 %v170_v8, %v141_v11 }
 0x10f   :  { %151 = vst.msk [vmem:[#allocation7 + $0x8] sm:$0xff] %vm56_vm0, %v147_v10 }
 0x110   :  { %150 = vst.msk [vmem:[#allocation7] sm:$0xff] %vm56_vm0, %v142_v12 }
 0x111   :  { %266 = shalt.err (!%p263_p6)
}
 0x112   :  { %s267_s15 = scalar_lea.hbm %s365_s3, 256 }
 0x113   :  { %p268_p7 = scmp.ne.s32.totalorder %s365_s3, %s267_s15  ;;  %p271_p8 = scmp.lt.u32.totalorder %s267_s15, %s365_s3 }
 0x115   :  { %p273_p9 = pnand %p271_p8, %p268_p7 }
 0x117   :  { %276 = shalt.err (!%p273_p9)
}
 0x118   :  { %163 = dma.vmem_to_hbm [thread:$0]  %s158_s12, 256, %s365_s3, [#allocation4], %s284_s22, %s284_s22, %s285_s23  }
 0x119   :  { %281 = dma.done.wait [#allocation4], 256  }
 0x11a   :  { %282 = vsyncadd [#allocation4], 4294967040 }
 0x11b   :  { %167 = vsyncpa [#allocation3], 1 }
 0x11c   :  { %168 = vsyncpa [#allocation6], 1 }
 0x11d   :  { %169 = vsyncpa [#allocation4], 1 }

</bundles_post_ra>
